<compile_context>
chip_gen: v5e
topology: v5e:2x2
jax: 0.10.0
libtpu: 0.0.40
codegen_flags: <defaults>
</compile_context>

<pallas_src>
import jax
import jax.numpy as jnp
from jax import lax
from jax.experimental import pallas as pl
from jax.experimental.pallas import tpu as pltpu


def _make_kernel(recompute_each_step):
    def kernel(x_ref, w_ref, bias_ref, o_ref, xn_ref):
        # x_ref:    (1, C,   T_HW)  VMEM  raw x tile (not normalized)
        # w_ref:    (1, T_K, C)     VMEM  pre-normalized w * exp(logit_scale)
        # bias_ref: (1,)            SMEM  scalar bias
        # o_ref:    (1, T_K, T_HW)  VMEM  output tile
        # xn_ref:   (C, T_HW)       VMEM scratch: x with unit column norms
        def normalize_x():
            xf = x_ref[0].astype(jnp.float32)                 # (C, T_HW)
            ss = jnp.sum(xf * xf, axis=0, keepdims=True)      # (1, T_HW)
            # rsqrt(max(ss, eps^2)) == 1 / max(||x||, eps), eps = 1e-12,
            # matching F.normalize's clamp. rsqrt runs on the EUP (free slot).
            inv = lax.rsqrt(jnp.maximum(ss, 1e-24))
            # TODO(synk): for bf16 x this rounds the normalized activations to
            # bf16 before the MXU (vs scaling an f32 accumulator) — negligible
            # for this head, exact for f32.
            xn_ref[...] = (xf * inv).astype(xn_ref.dtype)

        if recompute_each_step:
            normalize_x()                       # K axis may be "parallel"
        else:
            @pl.when(pl.program_id(2) == 0)     # once per (b, hw-tile)
            def _():
                normalize_x()

        # einsum 'bchw,bkc->bkhw' == per-batch (T_K, C) @ (C, T_HW) on the MXU.
        y = jnp.dot(w_ref[0], xn_ref[...], preferred_element_type=jnp.float32)
        o_ref[0] = (y + bias_ref[0]).astype(o_ref.dtype)

    return kernel


def _round_up(n, m):
    return -(-n // m) * m


def _pick_hw_tile(hw, *, lo=256, hi=2048, align=128):
    """Lane-dense HW tile: multiple of `align`, <= hi, minimal padding."""
    if hw <= hi:
        return _round_up(max(hw, align), align)     # whole map in one tile
    best_t, best_key = None, None
    t = (hi // align) * align
    while t >= lo:
        pad = _round_up(hw, t) - hw
        key = (pad, -t)                              # min pad, then biggest tile
        if best_key is None or key < best_key:
            best_key, best_t = key, t
        t -= align
    return best_t


def _pick_k_tile(k, dtype):
    """Sublane-packing / MXU-aware K tile."""
    sub = {4: 8, 2: 16, 1: 32}[jnp.dtype(dtype).itemsize]
    if k <= 256:
        return k              # full extent: always a legal block shape
    best_t, best_key = None, None
    for t in (256, 128):      # MXU-friendly multiples (both multiples of 32)
        if t % sub:
            continue
        pad = _round_up(k, t) - k
        key = (pad, -t)
        if best_key is None or key < best_key:
            best_key, best_t = key, t
    return best_t


def contrastive_head(x, w, logit_scale, bias):
    """x: (B, C, H, W), w: (B, K, C) -> (B, K, H, W) region-text logits."""
    B, C, H, W = x.shape
    _, K, _ = w.shape
    HW = H * W

    dtype = x.dtype
    itemsize = jnp.dtype(dtype).itemsize

    # Fold w normalization + exp(logit_scale) into the weight operand (plain
    # JAX, O(B*K*C) — negligible next to the B*K*C*HW matmul).
    w32 = w.astype(jnp.float32)
    wn = w32 * lax.rsqrt(
        jnp.maximum(jnp.sum(w32 * w32, axis=-1, keepdims=True), 1e-24))
    w_eff = (wn * jnp.exp(jnp.asarray(logit_scale, jnp.float32))).astype(dtype)

    bias_arr = jnp.asarray(bias, jnp.float32).reshape(1)

    # Lane-dense HW tiles via wrapper-side zero padding; dtype-aware K tiles.
    T_HW = _pick_hw_tile(HW)
    HW_pad = _round_up(HW, T_HW)
    T_K = _pick_k_tile(K, dtype)
    K_pad = _round_up(K, T_K)

    x_flat = x.reshape(B, C, HW)
    if HW_pad != HW:
        # Zero columns normalize to 0 (eps clamp), produce bias-only outputs,
        # and are sliced off below.
        x_flat = jnp.pad(x_flat, ((0, 0), (0, 0), (0, HW_pad - HW)))
    if K_pad != K:
        w_eff = jnp.pad(w_eff, ((0, 0), (0, K_pad - K), (0, 0)))

    n_hw = HW_pad // T_HW
    n_k = K_pad // T_K
    grid = (B, n_hw, n_k)

    # v7x has 2 TensorCores: if the "parallel" axes carry only one grid point
    # (B=1 inference on a small map), recompute xn every step so K can also be
    # split across cores.
    recompute_each_step = (B * n_hw) < 2
    dim_sem = (("parallel", "parallel", "parallel") if recompute_each_step
               else ("parallel", "parallel", "arbitrary"))

    # Explicit scoped-VMEM limit: double-buffered x/w/out blocks + xn scratch,
    # with headroom. Keeps large tiles compiling on v5e (16 MiB default) and
    # stays well under v7x's 64 MiB physical.
    vmem_need = (2 * (C * T_HW + T_K * C + T_K * T_HW) * itemsize
                 + C * T_HW * itemsize)
    vmem_limit = int(min(96 * 2 ** 20, max(32 * 2 ** 20, 2 * vmem_need)))

    cost = pl.CostEstimate(
        flops=2 * B * K_pad * C * HW_pad,
        transcendentals=B * HW_pad,
        bytes_accessed=(B * C * HW_pad            # x read
                        + B * K_pad * C * n_hw    # w re-read per HW tile
                        + B * K_pad * HW_pad      # out write
                        ) * itemsize,
    )

    out = pl.pallas_call(
        _make_kernel(recompute_each_step),
        out_shape=jax.ShapeDtypeStruct((B, K_pad, HW_pad), dtype),
        grid_spec=pltpu.PrefetchScalarGridSpec(
            num_scalar_prefetch=0,
            grid=grid,
            in_specs=[
                # x tile: independent of k -> stays resident across the K sweep.
                pl.BlockSpec((1, C, T_HW), lambda b, h, k: (b, 0, h)),
                pl.BlockSpec((1, T_K, C), lambda b, h, k: (b, k, 0)),
                pl.BlockSpec(memory_space=pltpu.MemorySpace.SMEM),
            ],
            out_specs=pl.BlockSpec((1, T_K, T_HW), lambda b, h, k: (b, k, h)),
            scratch_shapes=[pltpu.VMEM((C, T_HW), dtype)],
        ),
        compiler_params=pltpu.CompilerParams(
            dimension_semantics=dim_sem,
            vmem_limit_bytes=vmem_limit),
        cost_estimate=cost,
    )(x_flat, w_eff, bias_arr)

    out = out[:, :K, :HW]
    return out.reshape(B, K, H, W)


def _reference(x, w, logit_scale, bias):
    xn = x / jnp.maximum(
        jnp.sqrt(jnp.sum(x * x, axis=1, keepdims=True)), 1e-12)
    wn = w / jnp.maximum(
        jnp.sqrt(jnp.sum(w * w, axis=-1, keepdims=True)), 1e-12)
    y = jnp.einsum('bchw,bkc->bkhw', xn, wn)
    return y * jnp.exp(logit_scale) + bias


if __name__ == "__main__":
    B, C, H, W, K = 2, 32, 16, 16, 8   # embed dim C=32, K text/region queries

    key = jax.random.PRNGKey(0)
    kx, kw = jax.random.split(key, 2)
    x = jax.random.normal(kx, (B, C, H, W), dtype=jnp.float32)
    w = jax.random.normal(kw, (B, K, C), dtype=jnp.float32)

    # Module's own parameter init: bias = -10.0, logit_scale = log(1/0.07).
    bias = jnp.float32(-10.0)
    logit_scale = jnp.log(jnp.float32(1.0 / 0.07))

    out = contrastive_head(x, w, logit_scale, bias)
    out = jax.block_until_ready(out)

    ref = _reference(x, w, logit_scale, bias)
    assert out.shape == (B, K, H, W)
    assert jnp.allclose(out, ref, atol=1e-3, rtol=1e-3), "mismatch vs reference"

    print("KERNEL_OK")
</pallas_src>

<mosaic_0001>
module attributes {stable_mosaic.version = 11 : i64} {
  func.func @kernel(%arg0: i32, %arg1: i32, %arg2: i32, %arg3: memref<1x32x256xf32, #tpu.memory_space<vmem>>, %arg4: memref<1x8x32xf32, #tpu.memory_space<vmem>>, %arg5: memref<1xf32, #tpu.memory_space<smem>>, %arg6: memref<1x8x256xf32, #tpu.memory_space<vmem>>, %arg7: memref<32x256xf32, #tpu.memory_space<vmem>>) attributes {dimension_semantics = [#tpu.dimension_semantics<parallel>, #tpu.dimension_semantics<parallel>, #tpu.dimension_semantics<arbitrary>], iteration_bounds = array<i64: 2, 1, 1>, scalar_prefetch = 0 : i64, scratch_operands = 1 : i64, tpu.core_type = #tpu.core_type<tc>, window_params = [{transform_indices = @transform_0, window_bounds = array<i64: 1, 32, 256>}, {transform_indices = @transform_1, window_bounds = array<i64: 1, 8, 32>}, {transform_indices = @transform_2, window_bounds = array<i64: 1>}, {transform_indices = @transform_3, window_bounds = array<i64: 1, 8, 256>}]} {
    %c0_i32 = arith.constant 0 : i32
    %0 = arith.cmpi eq, %arg2, %c0_i32 : i32
    %1 = arith.extui %0 : i1 to i32
    %c0_i32_0 = arith.constant 0 : i32
    %2 = arith.cmpi ne, %1, %c0_i32_0 : i32
    scf.if %2 {
      %c0_9 = arith.constant 0 : index
      %c0_10 = arith.constant 0 : index
      %c0_11 = arith.constant 0 : index
      %13 = vector.load %arg3[%c0_9, %c0_10, %c0_11] : memref<1x32x256xf32, #tpu.memory_space<vmem>>, vector<1x32x256xf32>
      %14 = vector.shape_cast %13 : vector<1x32x256xf32> to vector<32x256xf32>
      %15 = arith.mulf %14, %14 : vector<32x256xf32>
      %cst_12 = arith.constant dense<0.000000e+00> : vector<256xf32>
      %16 = vector.multi_reduction <add>, %15, %cst_12 [0] : vector<32x256xf32> to vector<256xf32>
      %17 = vector.shape_cast %16 : vector<256xf32> to vector<1x256xf32>
      %cst_13 = arith.constant 1.000000e-24 : f32
      %18 = vector.broadcast %cst_13 : f32 to vector<1x256xf32>
      %19 = arith.maximumf %17, %18 : vector<1x256xf32>
      %20 = math.rsqrt %19 : vector<1x256xf32>
      %21 = vector.broadcast %20 : vector<1x256xf32> to vector<32x256xf32>
      %22 = arith.mulf %14, %21 : vector<32x256xf32>
      %c0_14 = arith.constant 0 : index
      %c0_15 = arith.constant 0 : index
      %23 = vector.load %arg7[%c0_14, %c0_15] : memref<32x256xf32, #tpu.memory_space<vmem>>, vector<32x256xf32>
      tpu.vector_store %arg7[%c0_14, %c0_15], %22 {strides = array<i32>} : memref<32x256xf32, #tpu.memory_space<vmem>>, vector<32x256xf32>,
    } else {
    }
    %c0 = arith.constant 0 : index
    %c0_1 = arith.constant 0 : index
    %c0_2 = arith.constant 0 : index
    %3 = vector.load %arg4[%c0, %c0_1, %c0_2] : memref<1x8x32xf32, #tpu.memory_space<vmem>>, vector<1x8x32xf32>
    %4 = vector.shape_cast %3 : vector<1x8x32xf32> to vector<8x32xf32>
    %c0_3 = arith.constant 0 : index
    %c0_4 = arith.constant 0 : index
    %5 = vector.load %arg7[%c0_3, %c0_4] : memref<32x256xf32, #tpu.memory_space<vmem>>, vector<32x256xf32>
    %cst = arith.constant dense<0.000000e+00> : vector<8x256xf32>
    %6 = tpu.matmul %4, %5, %cst {dimension_numbers = #tpu.dot_dimension_numbers<[1], [0], [0], [1], [0, 0, 1, 1], [], []>} : vector<8x32xf32>, vector<32x256xf32>, vector<8x256xf32> -> vector<8x256xf32>
    %c0_5 = arith.constant 0 : index
    %7 = memref.load %arg5[%c0_5] : memref<1xf32, #tpu.memory_space<smem>>
    %8 = vector.broadcast %7 : f32 to vector<8x256xf32>
    %9 = arith.addf %6, %8 : vector<8x256xf32>
    %c0_6 = arith.constant 0 : index
    %c0_7 = arith.constant 0 : index
    %c0_8 = arith.constant 0 : index
    %10 = vector.load %arg6[%c0_6, %c0_7, %c0_8] : memref<1x8x256xf32, #tpu.memory_space<vmem>>, vector<1x8x256xf32>
    %11 = vector.shape_cast %10 : vector<1x8x256xf32> to vector<8x256xf32>
    %12 = vector.shape_cast %9 : vector<8x256xf32> to vector<1x8x256xf32>
    tpu.vector_store %arg6[%c0_6, %c0_7, %c0_8], %12 {strides = array<i32>} : memref<1x8x256xf32, #tpu.memory_space<vmem>>, vector<1x8x256xf32>,
    return
  }
  func.func @transform_0(%arg0: i32, %arg1: i32, %arg2: i32) -> (i32, i32, i32) {
    %c0_i32 = arith.constant 0 : i32
    %c0_i32_0 = arith.constant 0 : i32
    return %arg0, %c0_i32, %arg1 : i32, i32, i32
  }
  func.func @transform_1(%arg0: i32, %arg1: i32, %arg2: i32) -> (i32, i32, i32) {
    %c0_i32 = arith.constant 0 : i32
    %c0_i32_0 = arith.constant 0 : i32
    return %arg0, %arg2, %c0_i32 : i32, i32, i32
  }
  func.func @transform_2(%arg0: i32, %arg1: i32, %arg2: i32) -> i32 {
    %c0_i32 = arith.constant 0 : i32
    %c0_i32_0 = arith.constant 0 : i32
    return %c0_i32 : i32
  }
  func.func @transform_3(%arg0: i32, %arg1: i32, %arg2: i32) -> (i32, i32, i32) {
    %c0_i32 = arith.constant 0 : i32
    return %arg0, %arg2, %arg1 : i32, i32, i32
  }
}

</mosaic_0001>

<bundles_post_ra>
// kernel: tpu_custom_call.1
= control target key start
LH: loop header
LB: loop body
LE: loop exit
PB: predicated region body
PF: predicated region fallthrough
CT: control target
= control target key end

     0   :  { %s945_s0 = inlined_call_operand.hbm [shape: f32[2,32,256], index: 0, kind: input, shape index: {}]   ;;  %s946_s1 = inlined_call_operand.hbm [shape: f32[2,8,32], index: 1, kind: input, shape index: {}]   ;;  %s947_s2 = inlined_call_operand.<no memory space> [shape: f32[1], index: 2, kind: input, shape index: {}]   ;;  %s948_s3 = inlined_call_operand.hbm [shape: f32[2,8,256], index: 3, kind: output, shape index: {}]  }
   0x1   :  { %8 = sst [smem:[#allocation3]] %s947_s2 }
   0x2   :  { %9 = vsyncpa [#allocation5], 0 }
   0x3   :  { %11 = vsyncpa [#allocation5 + $0x1], 0 }
   0x4   :  { %12 = vsyncpa [#allocation8], 0 }
   0x5   :  { %14 = vsyncpa [#allocation8 + $0x1], 0 }
   0x6   :  { %15 = vsyncpa [#allocation6], 0 }
   0x7   :  { %17 = vsyncpa [#allocation6 + $0x1], 0  ;;  %s798_s14 = smov 0   ;;  %s800_s15 = smov 0  }
   0x8   :  { %s802_s16 = smov 0   ;;  %s804_s17 = smov 0  }
   0x9   :  { %s806_s18 = smov 0   ;;  %s808_s19 = smov 0  }
   0xa LB: > { %s530_s2 = sadd.s32 4294967295, %s771_s19   ;;  %s531_s20 = sadd.s32 4294967294, %s771_s19   ;;  %s771_s19 = sphi %s808_s19, %s23_s19   ;;  %s767_s18 = sphi %s806_s18, %s958_s18   ;;  %s763_s17 = sphi %s804_s17, %s957_s17   ;;  %s759_s16 = sphi %s802_s16, %s956_s16   ;;  %s755_s15 = sphi %s800_s15, %s955_s15   ;;  %s751_s14 = sphi %s798_s14, %s954_s14  }
   0xb   : > { %s42_s21 = sadd.s32 1, %s767_s18  ;;  %s51_s22 = sadd.s32 1, %s759_s16 }
   0xc   : > { %p44_p0 = scmp.ge.s32.totalorder %s42_s21, 2  ;;  %p58_p1 = scmp.ne.s32.totalorder %s759_s16, %s755_s15 }
   0xd   : > { %p59_p2 = scmp.eq.s32.totalorder %s771_s19, 0  ;;  %p64_p3 = scmp.ne.s32.totalorder %s755_s15, %s751_s14 }
   0xe   : > { %s960_s21 = smov (%p44_p0, %s42_s21), 0  ;;  %p65_p5 = scmp.eq.s32.totalorder %s530_s2, 0 }
   0xf   : > { %p839_p4 = por %p59_p2, %p58_p1  ;;  %s46_s24 = ssub.s32 %s767_s18, %s960_s21 }
  0x10   : > { %p141_p6 = scmp.eq.s32.totalorder %s530_s2, 1  ;;  %p49_p7 = scmp.eq.s32.totalorder %s46_s24, 0 }
  0x11   : > { %p845_p8 = por %p65_p5, %p64_p3  ;;  %p147_p10 = scmp.eq.s32.totalorder %s531_s20, 1 }
  0x12   : > { %p849_p9 = por %p141_p6, %p58_p1  ;;  %p533_p12 = scmp.ge.s32.totalorder %s771_s19, 2 }
  0x13   : > { %s854_s27 = scalar_select %p49_p7, %s759_s16, %s51_s22  }
  0x14   : > { %p856_p11 = por %p147_p10, %p64_p3  ;;  %p569_p13 = scmp.lt.s32.totalorder %s771_s19, 2 }
  0x15   : > { %s170_s29 = sand.u32 1, %s759_s16   ;;  %s550_s4 = sshll.u32 %s767_s18, 6 }
  0x16   : > { %s534_s30 = sshll.u32 %s170_s29, 6  ;;  %s181_s7 = scalar_lea.hbm %s945_s0, %s550_s4 }
  0x17   : > { %s174_s8 = scalar_lea.vmem [#allocation4], %s534_s30  ;;  %s182_s10 = sshll.u32 %s181_s7, 4  ;;  %s183_s10 = int_to_ptr.hbm [resolvable:$true] %s182_s10 }
  0x18   : > { %s184_s9 = sshll.u32 %s174_s8, 4  ;;  %p869_p0 = pnand %p569_p13, %p839_p4  ;;  %s185_s9 = int_to_ptr.vmem [resolvable:$true] %s184_s9 }
  0x19   : > { %p539_p1 = scmp.ge.s32.totalorder %s771_s19, 1  ;;  %s171_s12 = scalar_lea.sflag [#allocation5], %s170_s29 }
  0x1a   : > { %s773_s13 = smov 256   ;;  %s774_s2 = smov 16  }
  0x1b   : > { %561 = dma.hbm_to_vmem [thread:$0]  (!%p869_p0), %s183_s10, 1024, %s185_s9, %s171_s12, %s773_s13, %s773_s13, %s774_s2  }
  0x1c   : > { %p212_p2 = scmp.lt.s32.totalorder %s771_s19, 3  ;;  %s537_s20 = sshll.u32 %s170_s29, 3 }
  0x1d   : > { %s538_s22 = sshll.u32 %s767_s18, 3  ;;  %s198_s4 = scalar_lea.vmem [#allocation7], %s537_s20 }
  0x1e   : > { %p213_p3 = pnand %p539_p1, %p212_p2  ;;  %s203_s23 = scalar_lea.hbm %s946_s1, %s538_s22 }
  0x1f   : > { %s207_s5 = sshll.u32 %s198_s4, 4  ;;  %s205_s6 = sshll.u32 %s203_s23, 4  ;;  %s208_s5 = int_to_ptr.vmem [resolvable:$true] %s207_s5  ;;  %s206_s6 = int_to_ptr.hbm [resolvable:$true] %s205_s6 }
  0x20   : > { %s195_s7 = scalar_lea.sflag [#allocation8], %s170_s29  ;;  %216 = sbr.rel (%p213_p3) target bundleno = 224 (0xe0), region = 32 }
  0x21   : > { %564 = dma.hbm_to_vmem [thread:$0]  (!%p869_p0), %s206_s6, 128, %s208_s5, %s195_s7  }
  0x22   : > { %s884_s8 = sand.u32 (!%p213_p3), 1, %s755_s15  }
  0x23   : > { %s540_s9 = sshll.u32 (!%p213_p3), %s884_s8, 6  ;;  %s219_s10 = scalar_lea.sflag (!%p213_p3), [#allocation5], %s884_s8 }
  0x24   : > { %s222_s12 = scalar_lea.vmem (!%p213_p3), [#allocation4], %s540_s9 }
  0x25   : > { %738 = dma.done.wait (%p845_p8), %s219_s10, 1024  }
  0x26   : > { %740 = vsyncadd (%p845_p8), %s219_s10, 4294966272  ;;  %s541_s29 = sshll.u32 %s884_s8, 3  ;;  %s229_s11 = scalar_lea.sflag [#allocation8], %s884_s8 }
  0x27   : > { %s894_s13 = scalar_lea.vmem [#allocation7], %s541_s29 }
  0x28   : > { %742 = dma.done.wait (%p845_p8), %s229_s11, 128  }
  0x29   : > { %744 = vsyncadd (%p845_p8), %s229_s11, 4294967168  ;;  %v900_v0 = vld [vmem:[%s222_s12] sm:$0xff]  ;;  %v269_v1 = vld [vmem:[%s222_s12 + $0x10] sm:$0xff]  ;;  %vm350_vm6 = vcmask 261120   ;;  %s348_s25 = sld [smem:[#allocation3]]  ;;  %s542_s2 = sshll.u32 %s884_s8, 4 }
  0x2a   : > { %v271_v2 = vld [vmem:[%s222_s12 + $0x20] sm:$0xff]  ;;  %v273_v3 = vld [vmem:[%s222_s12 + $0x30] sm:$0xff]  ;;  %v275_v4 = vmul.f32 %v900_v0, %v900_v0  ;;  %v277_v5 = vmul.f32 %v269_v1, %v269_v1  ;;  %v268_v7 = vld [vmem:[%s222_s12 + $0x8] sm:$0xff]  ;;  %s551_s20 = sshll.u32 %s763_s17, 4  ;;  %s260_s23 = scalar_lea.vmem [#allocation9], %s542_s2 }
  0x2b   : > { %v279_v6 = vmul.f32 %v271_v2, %v271_v2  ;;  %v270_v8 = vld [vmem:[%s222_s12 + $0x18] sm:$0xff]  ;;  %v272_v9 = vld [vmem:[%s222_s12 + $0x28] sm:$0xff]  ;;  %v276_v11 = vmul.f32 %v268_v7, %v268_v7  ;;  %v281_v13 = vmul.f32 %v273_v3, %v273_v3  ;;  %s412_s30 = scalar_lea.hbm %s948_s3, %s551_s20  ;;  %s414_s4 = sshll.u32 %s260_s23, 4  ;;  %s415_s4 = int_to_ptr.vmem [resolvable:$true] %s414_s4 }
  0x2c   : > { %v274_v10 = vld [vmem:[%s222_s12 + $0x38] sm:$0xff]  ;;  %v278_v12 = vmul.f32 %v270_v8, %v270_v8  ;;  %v283_v14 = vadd.f32 %v277_v5, %v275_v4  ;;  %v280_v15 = vmul.f32 %v272_v9, %v272_v9  ;;  %v339_v58 = vld [vmem:[%s894_s13] sm:$0xff]  ;;  %s416_s5 = sshll.u32 %s412_s30, 4  ;;  %s397_s6 = scalar_lea.sflag [#allocation6], %s884_s8  ;;  %s417_s5 = int_to_ptr.hbm [resolvable:$true] %s416_s5 }
  0x2d   : > { %v282_v16 = vmul.f32 %v274_v10, %v274_v10  ;;  %s699_s7 = sshra.s32 %s417_s5, 4  ;;  %s705_s12 = scalar_lea.hbm %s948_s3, 32  ;;  %s700_s7 = int_to_ptr.hbm [resolvable:$true] %s699_s7 }
  0x2e   : > { %v292_v17 = vadd.f32 %v278_v12, %v276_v11  ;;  %v284_v18 = vadd.f32 %v283_v14, %v279_v6  ;;  %s701_s17 = scalar_lea.hbm %s700_s7, 16  ;;  %p706_p7 = scmp.lt.s32.totalorder %s700_s7, %s948_s3 }
  0x2f   : > { %v349_v59 = vstv %s348_s25  ;;  %p702_p4 = scmp.ne.s32.totalorder %s700_s7, %s701_s17  ;;  %p707_p8 = scmp.lt.s32.totalorder %s705_s12, %s701_s17 }
  0x30   : > { %v293_v19 = vadd.f32 %v292_v17, %v280_v15  ;;  %v285_v20 = vadd.f32 %v284_v18, %v281_v13 }
  0x31   : > { %p703_p5 = pnand %p702_p4, %p849_p9  ;;  %p708_p10 = por %p707_p8, %p706_p7 }
  0x32   : > { %v294_v21 = vadd.f32 %v293_v19, %v282_v16  ;;  %v286_v22 = vrot.slane %v285_v20, 4 }
  0x33   : > { %p704_p6 = pneg %p703_p5 }
  0x34   : > { %v295_v23 = vrot.slane %v294_v21, 4  ;;  %v287_v24 = vadd.f32 %v286_v22, %v285_v20 }
  0x35   : > { %p709_p13 = pnand %p708_p10, %p704_p6 }
  0x36   : > { %v296_v25 = vadd.f32 %v295_v23, %v294_v21  ;;  %v288_v26 = vrot.slane %v287_v24, 2 }
  0x38   : > { %v297_v27 = vrot.slane %v296_v25, 2  ;;  %v289_v28 = vadd.f32 %v288_v26, %v287_v24 }
  0x3a   : > { %v298_v29 = vadd.f32 %v297_v27, %v296_v25  ;;  %v290_v30 = vrot.slane %v289_v28, 1 }
  0x3c   : > { %v299_v31 = vrot.slane %v298_v29, 1  ;;  %v291_v32 = vadd.f32 %v290_v30, %v289_v28 }
  0x3e   : > { %v300_v33 = vadd.f32 %v299_v31, %v298_v29  ;;  %v301_v34 = vmax.f32 %v291_v32, 1e-24 }
  0x40   : > { %v302_v35 = vmax.f32 %v300_v33, 1e-24  ;;  %621 = vrsqrt.f32 %v301_v34  ;;  %vm309_vm0 = vweird.f32 %v301_v34 }
  0x42   : > { %623 = vrsqrt.f32 %v302_v35  ;;  %vm319_vm2 = vweird.f32 %v302_v35 }
  0x46   : > { %v622_v36 = vpop.eup %621 }
  0x47   : > { %v304_v38 = vmul.f32 %v622_v36, %v301_v34  ;;  %vm310_vm1 = vweird.f32 %v622_v36 }
  0x48   : > { %v624_v37 = vpop.eup %623  ;;  %vm311_vm4 = vmor %vm309_vm0, %vm310_vm1 }
  0x49   : > { %v314_v39 = vmul.f32 %v624_v37, %v302_v35  ;;  %v305_v40 = vmul.f32 %v622_v36, %v304_v38  ;;  %vm320_vm3 = vweird.f32 %v624_v37 }
  0x4a   : > { %vm321_vm5 = vmor %vm319_vm2, %vm320_vm3 }
  0x4b   : > { %v315_v41 = vmul.f32 %v624_v37, %v314_v39  ;;  %v306_v42 = vmul.f32 0.5, %v305_v40 }
  0x4d   : > { %v316_v43 = vmul.f32 0.5, %v315_v41  ;;  %v307_v44 = vsub.f32 1.5, %v306_v42 }
  0x4f   : > { %v317_v45 = vsub.f32 1.5, %v316_v43  ;;  %v308_v46 = vmul.f32 %v622_v36, %v307_v44 }
  0x51   : > { %v318_v47 = vmul.f32 %v624_v37, %v317_v45  ;;  %v312_v48 = vsel %vm311_vm4, %v622_v36, %v308_v46 }
  0x52   : > { %v329_v49 = vmul.f32 %v312_v48, %v273_v3  ;;  %v327_v51 = vmul.f32 %v312_v48, %v271_v2  ;;  %v325_v54 = vmul.f32 %v312_v48, %v269_v1  ;;  %v323_v56 = vmul.f32 %v312_v48, %v900_v0 }
  0x53   : > { %v322_v50 = vsel %vm321_vm5, %v624_v37, %v318_v47 }
  0x54   : > { %v330_v52 = vmul.f32 %v322_v50, %v274_v10  ;;  %v328_v53 = vmul.f32 %v322_v50, %v272_v9  ;;  %366 = vmatpush.msra.mxu0 %v329_v49  ;;  %v326_v55 = vmul.f32 %v322_v50, %v270_v8  ;;  %v324_v57 = vmul.f32 %v322_v50, %v268_v7 }
  0x56   : > { %386 = vmatpush.msra.mxu1 %v330_v52  ;;  %367 = vmatpush.msra.mxu0 %v327_v51 }
  0x58   : > { %387 = vmatpush.msra.mxu1 %v328_v53  ;;  %368 = vmatpush.msra.mxu0 %v325_v54 }
  0x5a   : > { %388 = vmatpush.msra.mxu1 %v326_v55  ;;  %369 = vmatpush.msra.mxu0 %v323_v56 }
  0x5b   : > { %543 = vmatmul.msk.f32.vlgmr.msra.gmra.mxu0 %vm350_vm6, %v339_v58 }
  0x5c   : > { %389 = vmatpush.msra.mxu1 %v324_v57 }
  0x5d   : > { %544 = vmatmul.msk.f32.vlgmr.msra.gmra.mxu1 %vm350_vm6, %v339_v58 }
  0xd8   : > { %v371_v60 = vpop.f32.mrf.mxu0 }
  0xd9   : > { %v372_v61 = vadd.f32 %v371_v60, %v349_v59 }
  0xda   : > { %v391_v62 = vpop.f32.mrf.mxu1 }
  0xdb   : > { %v392_v63 = vadd.f32 %v391_v62, %v349_v59  ;;  %394 = vst [vmem:[%s260_s23] sm:$0xff] %v372_v61 }
  0xdd   : > { %395 = vst [vmem:[%s260_s23 + $0x8] sm:$0xff] %v392_v63 }
  0xde   : > { %712 = shalt.err (!%p709_p13)
}
  0xdf   : > { %556 = dma.vmem_to_hbm [thread:$0]  (%p849_p9), %s415_s4, 256, %s417_s5, %s397_s6  }
  0xe0 PF: > { %s428_s8 = sand.u32 1, %s751_s14   ;;  %p566_p0 = pnand %p533_p12, %p856_p11 }
  0xe1   : > { %s429_s13 = scalar_lea.sflag [#allocation6], %s428_s8 }
  0xe2   : > { %p567_p1 = pneg %p566_p0 }
  0xe4   : > { %746 = dma.done.wait (%p567_p1), %s429_s13, 256  }
  0xe5   : > { %748 = vsyncadd (%p567_p1), %s429_s13, 4294967040  ;;  %s23_s19 = sadd.s32 1, %s771_s19   ;;  %s954_s14 = smov %s755_s15 }
  0xe6   : > { %p20_p2 = scmp.ge.s32.totalorder %s23_s19, 4   ;;  %s955_s15 = smov %s759_s16 }
  0xe7   : > { %s956_s16 = smov %s854_s27  ;;  %s957_s17 = smov %s767_s18 }
  0xe8   : > { %s958_s18 = smov %s960_s21  ;;  %22 = sbr.rel (!%p20_p2) target bundleno = 10 (0xa), region = 94 }
  0xed   :  { %435 = vsyncpa [#allocation5], 1 }
  0xee   :  { %437 = vsyncpa [#allocation5 + $0x1], 1 }
  0xef   :  { %438 = vsyncpa [#allocation8], 1 }
  0xf0   :  { %440 = vsyncpa [#allocation8 + $0x1], 1 }
  0xf1   :  { %441 = vsyncpa [#allocation6], 1 }
  0xf2   :  { %443 = vsyncpa [#allocation6 + $0x1], 1 }

</bundles_post_ra>
